<compile_context>
chip_gen: v7x
topology: tpu7x:2x2x1
jax: 0.10.0
libtpu: 0.0.40
codegen_flags: <defaults>
</compile_context>

<pallas_src>
import math

import jax
import jax.numpy as jnp
from jax.experimental import pallas as pl
from jax.experimental.pallas import tpu as pltpu


# ----------------------------------------------------------------------------- utilities


def _pad(v: int, m: int) -> int:
    return ((v + m - 1) // m) * m


def _round_up(v: int, m: int) -> int:
    return ((v + m - 1) // m) * m


def _vmem_capacity_bytes() -> int:
    """Physical per-core VMEM; conservative v7x default if the query is unavailable."""
    try:
        cap = int(pltpu.get_tpu_info().vmem_capacity_bytes)
        if cap > 0:
            return cap
    except Exception:
        pass
    return 64 << 20


def _interp_matrix(in_size: int, out_size: int) -> jnp.ndarray:
    """1-D bilinear interpolation matrix, PyTorch align_corners=False semantics."""
    dst = jnp.arange(out_size, dtype=jnp.float32)
    # area_pixel_compute_source_index: src = (dst + 0.5) * (in/out) - 0.5, clamped at 0
    src = (dst + 0.5) * (float(in_size) / float(out_size)) - 0.5
    src = jnp.maximum(src, 0.0)
    x0 = jnp.floor(src).astype(jnp.int32)
    x0 = jnp.minimum(x0, in_size - 1)
    x1 = jnp.minimum(x0 + 1, in_size - 1)
    frac = src - x0.astype(jnp.float32)
    m = (jax.nn.one_hot(x0, in_size, dtype=jnp.float32) * (1.0 - frac)[:, None]
         + jax.nn.one_hot(x1, in_size, dtype=jnp.float32) * frac[:, None])
    return m  # (out_size, in_size)


# ----------------------------------------------------------------------------- kernel


def _interp_kernel(wy_ref, wxt_ref, x_ref, o_ref, t_ref):
    # wy:  (H_out, H)  f32           wxt: (W, W_out) f32
    # x:   (BC*H, W)   input dtype   o:   (BC, H_out, W_out) input dtype
    # t:   (BC*H, W_out) f32 scratch (W-pass result)
    h_out, h = wy_ref.shape
    bc = o_ref.shape[0]

    # ---- W-axis pass: ONE big MXU matmul over every plane in the block (M = BC*H). ----
    x = x_ref[...].astype(jnp.float32)                               # VPU upcast in VMEM
    t_ref[...] = jnp.dot(x, wxt_ref[...],
                         preferred_element_type=jnp.float32)         # (BC*H, W_out)

    # ---- H-axis pass: per-plane (H_out, H) @ (H, W_out); Wy shared, never broadcast. ----
    wy = wy_ref[...]

    @pl.loop(0, bc)
    def _(b):
        row0 = pl.multiple_of(b * h, h)
        tb = t_ref[pl.ds(row0, h), :]                                # (H, W_out)
        o_ref[b] = jnp.dot(wy, tb,
                           preferred_element_type=jnp.float32).astype(o_ref.dtype)


# ----------------------------------------------------------------------------- sizing


def _choose_bc(nc: int, H: int, W: int, H_out: int, W_out: int, dtype) -> tuple[int, int]:
    """Pick (#planes per grid step, vmem_limit_bytes), generation-aware.

    VMEM estimate uses (sublane, 128)-tile-padded sizes; budget/limit scale with the
    physical VMEM of the part (v5e/v6e 128 MiB, v7x 64 MiB)."""
    item = jnp.dtype(dtype).itemsize
    sub = max(8, 32 // item)                  # sublane tile: 8 f32, 16 bf16, 32 int8
    g = sub // math.gcd(H, sub)               # bc granularity keeping (bc*H, W) tile-legal

    cap = _vmem_capacity_bytes()
    budget = int(cap * 0.45)                  # blocks + scratch estimate headroom
    vmem_limit = min(int(cap * 0.75), 100 << 20)

    def step_bytes(bc):
        in_blk = 2 * _pad(bc * H, sub) * _pad(W, 128) * item            # dbl-buffered input
        out_blk = 2 * bc * _pad(H_out, sub) * _pad(W_out, 128) * item    # dbl-buffered output
        t_scr = _pad(bc * H, 8) * _pad(W_out, 128) * 4                   # f32 W-pass scratch
        x_f32 = _pad(bc * H, 8) * _pad(W, 128) * 4                       # in-kernel f32 cast
        return in_blk + out_blk + t_scr + x_f32

    fixed = (2 * (_pad(H_out, 8) * _pad(H, 128) + _pad(W, 8) * _pad(W_out, 128)) * 4
             + _pad(H_out, 8) * _pad(W_out, 128) * 4)                     # weights + plane result

    if g >= nc:
        return nc, vmem_limit

    # Largest bc that fits the budget.
    max_bc = g
    while max_bc + g <= nc and fixed + step_bytes(max_bc + g) <= budget:
        max_bc += g

    # Keep per-step input DMAs >= ~1 MiB where possible (HBM roofline needs big tiles) ...
    bc_floor = g
    while (bc_floor + g <= max_bc
           and _pad(bc_floor * H, sub) * _pad(W, 128) * item < (1 << 20)):
        bc_floor += g

    # ... but prefer ~8 grid steps so v7x's two TensorCores each pipeline >= 4 steps.
    desired = _round_up(max(1, pl.cdiv(nc, 8)), g)
    bc = min(max_bc, max(bc_floor, desired))

    # Never collapse to a single grid step when nc allows two (megacore + DMA overlap).
    if pl.cdiv(nc, bc) < 2 and nc > g:
        bc = min(bc, _round_up(pl.cdiv(nc, 2), g))
    bc = max(g, min(bc, nc))
    return bc, vmem_limit


# ----------------------------------------------------------------------------- wrapper


def interpolate_bilinear(x: jnp.ndarray, scale=2, mode: str = "bilinear") -> jnp.ndarray:
    """Pallas equivalent of F.interpolate(x, scale_factor=scale, mode='bilinear',
    align_corners=False) on an NCHW tensor.  Output dtype == input dtype."""
    if mode != "bilinear":
        raise NotImplementedError(f"mode={mode!r} not implemented")

    N, C, H, W = x.shape
    H_out = int(math.floor(H * scale))
    W_out = int(math.floor(W * scale))
    nc = N * C
    dtype = x.dtype
    item = jnp.dtype(dtype).itemsize

    wy = _interp_matrix(H, H_out)            # (H_out, H) f32
    wxt = _interp_matrix(W, W_out).T         # (W, W_out) f32

    bc, vmem_limit = _choose_bc(nc, H, W, H_out, W_out, dtype)
    grid = (pl.cdiv(nc, bc),)

    # Free view of the contiguous NCHW array; no dtype change, no extra HBM pass.
    x2 = x.reshape(nc * H, W)

    cost = pl.CostEstimate(
        flops=2 * nc * (H * W * W_out + H_out * H * W_out),
        transcendentals=0,
        bytes_accessed=(nc * H * W + nc * H_out * W_out) * item
        + (wy.size + wxt.size) * 4,
    )

    out = pl.pallas_call(
        _interp_kernel,
        out_shape=jax.ShapeDtypeStruct((nc, H_out, W_out), dtype),
        grid_spec=pltpu.PrefetchScalarGridSpec(
            num_scalar_prefetch=0,
            grid=grid,
            in_specs=[
                # Constant-index weight blocks: DMA'd once, resident for all steps.
                pl.BlockSpec((H_out, H), lambda i: (0, 0)),
                pl.BlockSpec((W, W_out), lambda i: (0, 0)),
                # BC planes per step, presented 2-D so the W-pass needs no reshape.
                pl.BlockSpec((bc * H, W), lambda i: (i, 0)),
            ],
            out_specs=pl.BlockSpec((bc, H_out, W_out), lambda i: (i, 0, 0)),
            scratch_shapes=[pltpu.VMEM((bc * H, W_out), jnp.float32)],
        ),
        compiler_params=pltpu.CompilerParams(
            dimension_semantics=("parallel",),
            vmem_limit_bytes=vmem_limit,
        ),
        cost_estimate=cost,
    )(wy, wxt, x2)

    return out.reshape(N, C, H_out, W_out)


# ----------------------------------------------------------------------------- reference


def _reference_bilinear(x: jnp.ndarray, scale: int = 2) -> jnp.ndarray:
    """Pure-JAX gather-based reference (matches PyTorch align_corners=False)."""
    N, C, H, W = x.shape
    H_out, W_out = H * scale, W * scale

    def src_coords(in_size, out_size):
        dst = jnp.arange(out_size, dtype=jnp.float32)
        src = jnp.maximum((dst + 0.5) * (in_size / out_size) - 0.5, 0.0)
        i0 = jnp.minimum(jnp.floor(src).astype(jnp.int32), in_size - 1)
        i1 = jnp.minimum(i0 + 1, in_size - 1)
        f = src - i0.astype(jnp.float32)
        return i0, i1, f

    y0, y1, fy = src_coords(H, H_out)
    x0, x1, fx = src_coords(W, W_out)

    g = lambda yi, xi: x[:, :, yi[:, None], xi[None, :]]
    top = g(y0, x0) * (1 - fx)[None, None, None, :] + g(y0, x1) * fx[None, None, None, :]
    bot = g(y1, x0) * (1 - fx)[None, None, None, :] + g(y1, x1) * fx[None, None, None, :]
    return top * (1 - fy)[None, None, :, None] + bot * fy[None, None, :, None]


if __name__ == "__main__":
    key = jax.random.PRNGKey(0)
    N, C, H, W = 2, 4, 16, 16
    x = jax.random.normal(key, (N, C, H, W), dtype=jnp.float32)

    out = interpolate_bilinear(x, scale=2, mode="bilinear")
    out = jax.block_until_ready(out)

    ref = _reference_bilinear(x, scale=2)
    assert out.shape == (N, C, 2 * H, 2 * W), out.shape
    assert out.dtype == x.dtype, out.dtype
    assert jnp.allclose(out, ref, atol=1e-5, rtol=1e-5), float(jnp.max(jnp.abs(out - ref)))

    print("KERNEL_OK")
</pallas_src>

<mosaic_0001>
module attributes {stable_mosaic.version = 11 : i64} {
  func.func @_interp_kernel(%arg0: i32, %arg1: memref<32x16xf32, #tpu.memory_space<vmem>>, %arg2: memref<16x32xf32, #tpu.memory_space<vmem>>, %arg3: memref<64x16xf32, #tpu.memory_space<vmem>>, %arg4: memref<4x32x32xf32, #tpu.memory_space<vmem>>, %arg5: memref<64x32xf32, #tpu.memory_space<vmem>>) attributes {dimension_semantics = [#tpu.dimension_semantics<parallel>], iteration_bounds = array<i64: 2>, scalar_prefetch = 0 : i64, scratch_operands = 1 : i64, tpu.core_type = #tpu.core_type<tc>, window_params = [{pipeline_mode = #tpu.pipeline_mode<synchronous>, transform_indices = @transform_0, window_bounds = array<i64: 32, 16>}, {pipeline_mode = #tpu.pipeline_mode<synchronous>, transform_indices = @transform_1, window_bounds = array<i64: 16, 32>}, {transform_indices = @transform_2, window_bounds = array<i64: 64, 16>}, {transform_indices = @transform_3, window_bounds = array<i64: 4, 32, 32>}]} {
    %c0 = arith.constant 0 : index
    %c0_0 = arith.constant 0 : index
    %0 = vector.load %arg3[%c0, %c0_0] : memref<64x16xf32, #tpu.memory_space<vmem>>, vector<64x16xf32>
    %c0_1 = arith.constant 0 : index
    %c0_2 = arith.constant 0 : index
    %1 = vector.load %arg2[%c0_1, %c0_2] : memref<16x32xf32, #tpu.memory_space<vmem>>, vector<16x32xf32>
    %cst = arith.constant dense<0.000000e+00> : vector<64x32xf32>
    %2 = tpu.matmul %0, %1, %cst {dimension_numbers = #tpu.dot_dimension_numbers<[1], [0], [0], [1], [0, 0, 1, 1], [], []>} : vector<64x16xf32>, vector<16x32xf32>, vector<64x32xf32> -> vector<64x32xf32>
    %c0_3 = arith.constant 0 : index
    %c0_4 = arith.constant 0 : index
    %3 = vector.load %arg5[%c0_3, %c0_4] : memref<64x32xf32, #tpu.memory_space<vmem>>, vector<64x32xf32>
    tpu.vector_store %arg5[%c0_3, %c0_4], %2 {strides = array<i32>} : memref<64x32xf32, #tpu.memory_space<vmem>>, vector<64x32xf32>,
    %c0_5 = arith.constant 0 : index
    %c0_6 = arith.constant 0 : index
    %4 = vector.load %arg1[%c0_5, %c0_6] : memref<32x16xf32, #tpu.memory_space<vmem>>, vector<32x16xf32>
    %c0_i32 = arith.constant 0 : i32
    %c4_i32 = arith.constant 4 : i32
    %5 = arith.addi %c0_i32, %c4_i32 : i32
    %c1_i32 = arith.constant 1 : i32
    scf.for %arg6 = %c0_i32 to %5 step %c1_i32  : i32 {
      %c1_i32_8 = arith.constant 1 : i32
      %6 = arith.muli %arg6, %c1_i32_8 : i32
      %c0_i32_9 = arith.constant 0 : i32
      %7 = arith.addi %c0_i32_9, %6 : i32
      %c16_i32 = arith.constant 16 : i32
      %8 = arith.muli %7, %c16_i32 : i32
      %9 = tpu.assume_multiple %8, 16 : i32
      %10 = arith.index_cast %9 : i32 to index
      %c0_10 = arith.constant 0 : index
      %11 = vector.load %arg5[%10, %c0_10] : memref<64x32xf32, #tpu.memory_space<vmem>>, vector<16x32xf32>
      %cst_11 = arith.constant dense<0.000000e+00> : vector<32x32xf32>
      %12 = tpu.matmul %4, %11, %cst_11 {dimension_numbers = #tpu.dot_dimension_numbers<[1], [0], [0], [1], [0, 0, 1, 1], [], []>} : vector<32x16xf32>, vector<16x32xf32>, vector<32x32xf32> -> vector<32x32xf32>
      %13 = arith.index_cast %7 : i32 to index
      %c0_12 = arith.constant 0 : index
      %c0_13 = arith.constant 0 : index
      %14 = vector.load %arg4[%13, %c0_12, %c0_13] : memref<4x32x32xf32, #tpu.memory_space<vmem>>, vector<1x32x32xf32>
      %15 = vector.shape_cast %14 : vector<1x32x32xf32> to vector<32x32xf32>
      %16 = vector.shape_cast %12 : vector<32x32xf32> to vector<1x32x32xf32>
      tpu.vector_store %arg4[%13, %c0_12, %c0_13], %16 {strides = array<i32>} : memref<4x32x32xf32, #tpu.memory_space<vmem>>, vector<1x32x32xf32>,
    }
    %c4_i32_7 = arith.constant 4 : i32
    return
  }
  func.func @transform_0(%arg0: i32) -> (i32, i32) {
    %c0_i32 = arith.constant 0 : i32
    %c0_i32_0 = arith.constant 0 : i32
    %c0_i32_1 = arith.constant 0 : i32
    return %c0_i32, %c0_i32_0 : i32, i32
  }
  func.func @transform_1(%arg0: i32) -> (i32, i32) {
    %c0_i32 = arith.constant 0 : i32
    %c0_i32_0 = arith.constant 0 : i32
    %c0_i32_1 = arith.constant 0 : i32
    return %c0_i32, %c0_i32_0 : i32, i32
  }
  func.func @transform_2(%arg0: i32) -> (i32, i32) {
    %c0_i32 = arith.constant 0 : i32
    %c0_i32_0 = arith.constant 0 : i32
    return %arg0, %c0_i32 : i32, i32
  }
  func.func @transform_3(%arg0: i32) -> (i32, i32, i32) {
    %c0_i32 = arith.constant 0 : i32
    %c0_i32_0 = arith.constant 0 : i32
    %c0_i32_1 = arith.constant 0 : i32
    return %arg0, %c0_i32, %c0_i32_0 : i32, i32, i32
  }
}

</mosaic_0001>

<bundles_post_ra>
// kernel: tpu_custom_call.1
= control target key start
LH: loop header
LB: loop body
LE: loop exit
PB: predicated region body
PF: predicated region fallthrough
CT: control target
= control target key end

     0   :  { %8 = vsyncpa [#allocation4], 0  ;;  %s911_s0 = inlined_call_operand.vmem [shape: f32[32,16], index: 0, kind: input, shape index: {}]   ;;  %s912_s1 = inlined_call_operand.vmem [shape: f32[16,32], index: 1, kind: input, shape index: {}]   ;;  %s913_s2 = inlined_call_operand.vmem [shape: f32[128,16], index: 2, kind: input, shape index: {}]   ;;  %s914_s3 = inlined_call_operand.hbm [shape: f32[8,32,32], index: 3, kind: output, shape index: {}]  }
   0x1   :  { %10 = vsyncpa [#allocation4 + $0x1], 0  ;;  %s751_s12 = smov 0   ;;  %s753_s13 = smov 0  }
   0x2   :  { %s755_s14 = smov 0   ;;  %s757_s15 = smov 0  }
   0x3 LB: > { %s772_s16 = sadd.s32 4294967295, %s722_s15   ;;  %s524_s17 = sadd.s32 4294967294, %s722_s15   ;;  %s722_s15 = sphi %s757_s15, %s920_s15   ;;  %s718_s14 = sphi %s755_s14, %s919_s14   ;;  %s714_s13 = sphi %s753_s13, %s918_s13   ;;  %s710_s12 = sphi %s751_s12, %s917_s12  }
   0x4   : > { %s776_s18 = sadd.s32 1, %s722_s15   ;;  %s91_s19 = sadd.s32 1, %s718_s14 }
   0x5   : > { %s88_s20 = ssub.s32 %s722_s15, %s776_s18  ;;  %p101_p0 = scmp.ne.s32.totalorder %s718_s14, %s714_s13 }
   0x6   : > { %p89_p1 = scmp.eq.s32.totalorder %s88_s20, 0  ;;  %p102_p2 = scmp.eq.s32.totalorder %s772_s16, 1 }
   0x7   : > { %p107_p3 = scmp.ne.s32.totalorder %s714_s13, %s710_s12  ;;  %p108_p4 = scmp.eq.s32.totalorder %s524_s17, 1 }
   0x8   : > { %s787_s21 = scalar_select %p89_p1, %s718_s14, %s91_s19  }
   0x9   : > { %p789_p5 = por %p102_p2, %p101_p0  ;;  %p793_p6 = por %p108_p4, %p107_p3 }
   0xa   : > { %p527_p7 = scmp.ge.s32.totalorder %s722_s15, 1  ;;  %p141_p8 = scmp.lt.s32.totalorder %s722_s15, 3 }
   0xc   : > { %p142_p9 = pnand %p527_p7, %p141_p8 }
   0xd   : > { %s162_s24 = sand.u32 (!%p142_p9), 1, %s714_s13   ;;  %v180_v0 = vld [vmem:[%s912_s1] sm:$0xff] (!%p142_p9)  ;;  %v181_v1 = vld [vmem:[%s912_s1 + $0x8] sm:$0xff] (!%p142_p9)  ;;  %s529_s29 = sshll.u32 (!%p142_p9), %s772_s16, 3  ;;  %vm182_vm0 = vcmask (!%p142_p9), 130048   ;;  %v323_v13 = vld [vmem:[%s911_s0 + $0x10] sm:$0xff] (!%p142_p9) }
   0xe   : > { %145 = sbr.rel (%p142_p9) target bundleno = 486 (0x1e6), region = 32  ;;  %s809_s30 = sshll.u32 (!%p142_p9), %s162_s24, 7  ;;  %v595_v2 = vpack.c.bf16 (!%p142_p9), %v181_v1, %v180_v0  ;;  %v321_v11 = vld [vmem:[%s911_s0] sm:$0xff] (!%p142_p9)  ;;  %v322_v12 = vld [vmem:[%s911_s0 + $0x8] sm:$0xff] (!%p142_p9)  ;;  %v324_v14 = vld [vmem:[%s911_s0 + $0x18] sm:$0xff] (!%p142_p9)  ;;  %vm312_vm1 = vcmask (!%p142_p9), 261120  }
   0xf   : > { %p166_p10 = scmp.lt.s32.totalorder (!%p142_p9), %s529_s29, 15  ;;  %s164_s26 = scalar_lea.vmem (!%p142_p9), [#allocation3], %s809_s30 }
  0x10   : > { %596 = vmatprep.subr.bf16.mxu0 (!%p142_p9), %v595_v2  ;;  %603 = vmatprep.subr.bf16.mxu1 (!%p142_p9), %v595_v2  ;;  %s843_s27 = smov (!%p142_p9), 0  }
  0x11   : > { %598 = vmatpush3.bf16.msra.mxu0 (!%p142_p9), %v595_v2  ;;  %604 = vmatpush3.bf16.msra.mxu1 (!%p142_p9), %v595_v2 }
  0x15   : > { %s922_s29 = smov (!%p166_p10, %s529_s29), 15 }
  0x16   : > { %s530_s4 = sshll.u32 %s922_s29, 3 }
  0x17   : > { %s169_s7 = scalar_lea.vmem %s913_s2, %s530_s4 }
  0x18   : > { %v172_v3 = vld [vmem:[%s169_s7] sm:$0xff]  ;;  %v173_v5 = vld [vmem:[%s169_s7 + $0x8] sm:$0xff]  ;;  %v174_v7 = vld [vmem:[%s169_s7 + $0x10] sm:$0xff] }
  0x19   : > { %v176_v4 = vld [vmem:[%s169_s7 + $0x20] sm:$0xff]  ;;  %573 = vmatprep.mubr.msk.f32.mxu0 %vm182_vm0, %v172_v3  ;;  %v177_v6 = vld [vmem:[%s169_s7 + $0x28] sm:$0xff]  ;;  %v178_v8 = vld [vmem:[%s169_s7 + $0x30] sm:$0xff] }
  0x1a   : > { %579 = vmatprep.mubr.msk.f32.mxu1 %vm182_vm0, %v176_v4  ;;  %574 = vmatmul.mubr.msk.f32.vlgmr.msra.gmra.mrb[0].mxu0 %vm182_vm0, %v173_v5  ;;  %v175_v9 = vld [vmem:[%s169_s7 + $0x18] sm:$0xff] }
  0x1b   : > { %580 = vmatmul.mubr.msk.f32.vlgmr.msra.gmra.mrb[0].mxu1 %vm182_vm0, %v177_v6  ;;  %576 = vmatprep.mubr.msk.f32.mxu0 %vm182_vm0, %v174_v7  ;;  %v179_v10 = vld [vmem:[%s169_s7 + $0x38] sm:$0xff] }
  0x1c   : > { %582 = vmatprep.mubr.msk.f32.mxu1 %vm182_vm0, %v178_v8 }
  0x1e   : > { %577 = vmatmul.mubr.msk.f32.gmra.mrb[2].mxu0 %vm182_vm0, %v175_v9 }
  0x1f   : > { %583 = vmatmul.mubr.msk.f32.gmra.mrb[2].mxu1 %vm182_vm0, %v179_v10 }
  0xed   : > { %v575_v15 = vpop.f32.mrb[0].mxu0 }
  0xee   : > { %v581_v16 = vpop.f32.mrb[0].mxu1  ;;  %314 = vst.msk [vmem:[#allocation2 + $0x8] sm:$0xff] %vm312_vm1, %v575_v15  ;;  %v273_v17 = vpop.f32.mrb[1].mxu0 }
  0xef   : > { %318 = vst.msk [vmem:[#allocation2 + $0x28] sm:$0xff] %vm312_vm1, %v581_v16  ;;  %v293_v18 = vpop.f32.mrb[1].mxu1  ;;  %313 = vst.msk [vmem:[#allocation2] sm:$0xff] %vm312_vm1, %v273_v17 }
  0xf0   : > { %317 = vst.msk [vmem:[#allocation2 + $0x20] sm:$0xff] %vm312_vm1, %v293_v18 }
  0xf1   : > { %v578_v19 = vpop.f32.mrb[2].mxu0 }
  0xf2   : > { %v584_v20 = vpop.f32.mrb[2].mxu1  ;;  %316 = vst.msk [vmem:[#allocation2 + $0x18] sm:$0xff] %vm312_vm1, %v578_v19  ;;  %v283_v21 = vpop.f32.mrb[3].mxu0 }
  0xf3   : > { %320 = vst.msk [vmem:[#allocation2 + $0x38] sm:$0xff] %vm312_vm1, %v584_v20  ;;  %v303_v22 = vpop.f32.mrb[3].mxu1  ;;  %315 = vst.msk [vmem:[#allocation2 + $0x10] sm:$0xff] %vm312_vm1, %v283_v21 }
  0xf4   : > { %319 = vst.msk [vmem:[#allocation2 + $0x30] sm:$0xff] %vm312_vm1, %v303_v22 }
  0xf5 LB: >> { %589 = vmatprep.mubr.msk.f32.mxu0 %vm182_vm0, %v321_v11  ;;  %592 = vmatprep.mubr.msk.f32.mxu1 %vm182_vm0, %v323_v13  ;;  %s539_s28 = sshll.u32 %s726_s27, 4  ;;  %s544_s4 = sshll.u32 %s726_s27, 5  ;;  %s726_s27 = sphi %s843_s27, %s330_s27  }
  0xf6   : >> { %s332_s29 = scalar_lea.vmem [#allocation2], %s539_s28  ;;  %s433_s5 = scalar_lea.vmem %s164_s26, %s544_s4 [#allocation3] }
  0xf7   : >> { %s330_s27 = sadd.s32 1, %s726_s27  }
  0xf8   : >> { %p327_p11 = scmp.ge.s32.totalorder %s330_s27, 4  }
  0xf9   : > { %s552_s6 = sshll.u32 (%p327_p11), %s772_s16, 11  ;;  %s453_s10 = sshll.u32 (%p327_p11), %s164_s26, 4  ;;  %s866_s10 = int_to_ptr.vmem [resolvable:$true] %s453_s10 }
  0xfa   : > { %s862_s9 = scalar_lea.hbm (%p327_p11), %s914_s3, %s552_s6  ;;  %s870_s11 = scalar_lea.sflag (%p327_p11), [#allocation4], %s162_s24 }
  0xfb   : >> { %v333_v23 = vld [vmem:[%s332_s29] sm:$0xff]  ;;  %v334_v24 = vld [vmem:[%s332_s29 + $0x8] sm:$0xff]  ;;  %s656_s17 = scalar_lea.vmem (%p327_p11), %s866_s10, 2048  ;;  %s728_s16 = smov (%p327_p11), [#allocation3]  }
  0xfc   : >> { %v599_v25 = vpack.c.bf16 %v334_v24, %v333_v23  ;;  %p657_p12 = scmp.ne.s32.totalorder (%p327_p11), %s866_s10, %s656_s17  ;;  %s660_s19 = sshll.u32 (%p327_p11), %s728_s16, 4  ;;  %s661_s19 = int_to_ptr.vmem [resolvable:$false] %s660_s19 }
  0xfd   : > { %s662_s20 = scalar_lea.vmem (%p327_p11), %s661_s19, 4096  ;;  %p663_p1 = scmp.lt.s32.totalorder (%p327_p11), %s866_s10, %s661_s19 }
  0xfe   : >> { %600 = vmatprep.subr.bf16.mxu0 %v599_v25  ;;  %605 = vmatprep.subr.bf16.mxu1 %v599_v25  ;;  %p658_p13 = pnand (%p327_p11), %p657_p12, %p789_p5  ;;  %p664_p2 = scmp.lt.s32.totalorder (%p327_p11), %s662_s20, %s656_s17 }
  0xff   : >> { %602 = vmatpush3.bf16.msra.mxu0 %v599_v25  ;;  %606 = vmatpush3.bf16.msra.mxu1 %v599_v25 }
 0x100   : > { %p659_p0 = pneg (%p327_p11), %p658_p13  ;;  %p665_p3 = por (%p327_p11), %p664_p2, %p663_p1 }
 0x102   : >> { %590 = vmatmul.mubr.msk.f32.vlgmr.msra.gmra.mrb[0].mxu0 %vm182_vm0, %v322_v12  ;;  %593 = vmatmul.mubr.msk.f32.vlgmr.msra.gmra.mrb[0].mxu1 %vm182_vm0, %v324_v14  ;;  %p666_p4 = pnand (%p327_p11), %p665_p3, %p659_p0 }
 0x1d1   : > { %329 = sbr.rel (!%p327_p11) target bundleno = 245 (0xf5), region = 76 }
 0x1d5   : >> { %v591_v26 = vpop.f32.mrb[0].mxu0  ;;  %v594_v27 = vpop.f32.mrb[0].mxu1 }
 0x1d6   : >> { %435 = vst.msk [vmem:[%s433_s5 + $0x8] sm:$0xff] %vm312_vm1, %v591_v26  ;;  %437 = vst.msk [vmem:[%s433_s5 + $0x18] sm:$0xff] %vm312_vm1, %v594_v27  ;;  %v413_v28 = vpop.f32.mrb[1].mxu0  ;;  %v423_v29 = vpop.f32.mrb[1].mxu1 }
 0x1d7   : >> { %434 = vst.msk [vmem:[%s433_s5] sm:$0xff] %vm312_vm1, %v413_v28  ;;  %436 = vst.msk [vmem:[%s433_s5 + $0x10] sm:$0xff] %vm312_vm1, %v423_v29 }
 0x1d8   : > { %669 = shalt.err (!%p666_p4)
}
 0x1d9   : > { %s670_s24 = scalar_lea.hbm %s862_s9, 2048  ;;  %s674_s26 = scalar_lea.hbm %s914_s3, 4096 }
 0x1da   : > { %p671_p7 = scmp.ne.s32.totalorder %s862_s9, %s670_s24  ;;  %p675_p10 = scmp.lt.u32.totalorder %s862_s9, %s914_s3 }
 0x1db   : > { %p676_p11 = scmp.lt.u32.totalorder %s674_s26, %s670_s24  ;;  %p678_p13 = scmp.lt.u32.totalorder %s670_s24, %s862_s9 }
 0x1dc   : > { %p672_p8 = pnand %p671_p7, %p789_p5 }
 0x1dd   : > { %p677_p12 = por %p676_p11, %p675_p10 }
 0x1de   : > { %p673_p9 = pneg %p672_p8 }
 0x1df   : > { %p679_p0 = por %p678_p13, %p677_p12 }
 0x1e1   : > { %p680_p1 = pnand %p679_p0, %p673_p9 }
 0x1e3   : > { %683 = shalt.err (!%p680_p1)
}
 0x1e4   : > { %s729_s29 = smov 128   ;;  %s730_s4 = smov 8  }
 0x1e5   : > { %607 = dma.vmem_to_hbm [thread:$0]  (%p789_p5), %s866_s10, 2048, %s862_s9, %s870_s11, %s729_s29, %s729_s29, %s730_s4  }
 0x1e6 PF: > { %p613_p2 = scmp.ge.s32.totalorder %s722_s15, 2  ;;  %s468_s5 = sand.u32 1, %s710_s12  }
 0x1e7   : > { %s469_s6 = scalar_lea.sflag [#allocation4], %s468_s5 }
 0x1e8   : > { %p610_p3 = pnand %p613_p2, %p793_p6 }
 0x1ea   : > { %705 = dma.done.wait (!%p610_p3), %s469_s6, 2048  }
 0x1eb   : > { %707 = vsyncadd (!%p610_p3), %s469_s6, 4294965248  ;;  %p13_p4 = scmp.ge.s32.totalorder %s776_s18, 4   ;;  %s917_s12 = smov %s714_s13 }
 0x1ec   : > { %s918_s13 = smov %s718_s14  ;;  %s919_s14 = smov %s787_s21 }
 0x1ed   : > { %s920_s15 = smov %s776_s18  ;;  %15 = sbr.rel (!%p13_p4) target bundleno = 3 (0x3), region = 87 }
 0x1f4   :  { %474 = vsyncpa [#allocation4], 1 }
 0x1f5   :  { %476 = vsyncpa [#allocation4 + $0x1], 1 }

</bundles_post_ra>
